<compile_context>
chip_gen: v7x
topology: tpu7x:2x2x1
jax: 0.10.0
libtpu: 0.0.40
codegen_flags: <defaults>
</compile_context>

<pallas_src>
import jax
import jax.numpy as jnp
import numpy as np
from jax.experimental import pallas as pl
from jax.experimental.pallas import tpu as pltpu


def _lincrf_kernel(ids_ref, w_big_ref, w_rec_ref, vals_ref, rec_ref):
    R = ids_ref.shape[0] // 4          # padded output-row count (multiple of 8)
    L = w_big_ref.shape[0]             # 2*V + 2 one-hot lanes

    # Build the multi-hot selection matrix: each output row activates up to 4
    # rows of w_big (next-token emission, constant row, and -- only at t==0 --
    # first-token emission + first-token bias).  Sentinel id -1 never matches.
    lane = jax.lax.broadcasted_iota(jnp.int32, (R, L), 1)
    oh = ((lane == ids_ref[0 * R:1 * R]).astype(jnp.float32)
          + (lane == ids_ref[1 * R:2 * R]).astype(jnp.float32)
          + (lane == ids_ref[2 * R:3 * R]).astype(jnp.float32)
          + (lane == ids_ref[3 * R:4 * R]).astype(jnp.float32))

    # Single MXU call produces the lane-dense (R, C*C) vals slab directly.
    vals_ref[...] = jnp.dot(oh, w_big_ref[...],
                            preferred_element_type=jnp.float32,
                            precision=jax.lax.Precision.HIGHEST)

    # rec_emission log-softmax over the vocab axis (lane axis of the (C, V)
    # tile); the wrapper transposes back to (V, C) under jit.
    w = w_rec_ref[...]
    m = jnp.max(w, axis=-1, keepdims=True)
    z = w - m
    rec_ref[...] = z - jnp.log(jnp.sum(jnp.exp(z), axis=-1, keepdims=True))


@jax.jit
def lincrf_forward(words, w_lin, b_lin, w_trans, w_rec):
    B, N = words.shape
    C, V = w_lin.shape
    Nm1 = N - 1
    Bout = B * Nm1
    R = ((Bout + 7) // 8) * 8          # pad rows to a sublane multiple

    words = words.astype(jnp.int32)
    w_lin = w_lin.astype(jnp.float32)
    b_lin = b_lin.astype(jnp.float32)
    w_trans = w_trans.astype(jnp.float32)
    w_rec = w_rec.astype(jnp.float32)

    # ---- packed id table (index plumbing only, no model arithmetic) ---------
    next_ids = words[:, 1:]                                        # words[b, t+1]
    first_b = jnp.broadcast_to(words[:, :1], (B, Nm1))             # words[b, 0]
    is_t0 = jnp.broadcast_to(
        (jnp.arange(Nm1, dtype=jnp.int32) == 0)[None, :], (B, Nm1))
    col0 = next_ids                                                # emission(next)
    col1 = jnp.where(is_t0, V + first_b, -1)                       # emission(first) @ t==0
    col2 = jnp.where(is_t0, jnp.int32(2 * V), -1)                  # bias(first)     @ t==0
    col3 = jnp.full((B, Nm1), 2 * V + 1, jnp.int32)                # W_trans + bias(next)
    cols = jnp.stack([col0, col1, col2, col3], 0).reshape(4, Bout)
    if R > Bout:                                                   # zero pad rows
        cols = jnp.concatenate(
            [cols, jnp.full((4, R - Bout), -1, jnp.int32)], axis=1)
    ids = cols.reshape(4 * R, 1)

    # ---- augmented weight slab (layout glue; fused/folded under jit) --------
    w_lin_t = w_lin.T                                              # (V, C)
    w_rep = jnp.repeat(w_lin_t, C, axis=1)                         # [v, i*C+j] = W^T[v, i]
    w_tile = jnp.tile(w_lin_t, (1, C))                             # [v, i*C+j] = W^T[v, j]
    b_tile = jnp.tile(b_lin, C)[None, :]                           # b[j]
    const = (w_trans.reshape(1, C * C)
             + jnp.repeat(b_lin, C)[None, :])                      # W_trans[i,j] + b[i]
    w_big = jnp.concatenate([w_rep, w_tile, b_tile, const], axis=0)  # (2V+2, C*C)

    vmem = pl.BlockSpec(memory_space=pltpu.MemorySpace.VMEM)
    vals_flat, rec_cv = pl.pallas_call(
        _lincrf_kernel,
        out_shape=(jax.ShapeDtypeStruct((R, C * C), jnp.float32),  # lane-dense vals
                   jax.ShapeDtypeStruct((C, V), jnp.float32)),     # log-softmax (C, V)
        in_specs=[vmem, vmem, vmem],
        out_specs=(vmem, vmem),
    )(ids, w_big, w_rec)

    vals = vals_flat[:Bout].reshape(B, Nm1, C, C)
    return vals, rec_cv.T


def reference(words, w_lin, b_lin, w_trans, w_rec):
    # Pure-JAX mirror of the PyTorch forward; emission computed by exact
    # gather (no default-precision matmul) so the 1e-5 check is not flaky.
    final = w_lin.T[words] + b_lin                                 # (B, N, C)
    vals = final[:, 1:, :, None] + w_trans[None, None, :, :]
    vals = vals.at[:, 0, :, :].add(final[:, 0, None, :])
    rec = jax.nn.log_softmax(w_rec.T, axis=0)
    return vals, rec


if __name__ == "__main__":
    B, N = 2, 8          # batch, sequence length
    VOC, C = 32, 16      # voc_size, num_pos_tags

    key = jax.random.PRNGKey(0)
    k1, k2, k3, k4, k5 = jax.random.split(key, 5)
    words = jax.random.randint(k1, (B, N), 0, VOC, dtype=jnp.int32)
    w_lin = jax.random.normal(k2, (C, VOC), dtype=jnp.float32) * 0.1   # linear.weight
    b_lin = jax.random.normal(k3, (C,), dtype=jnp.float32) * 0.1       # linear.bias
    w_trans = jax.random.normal(k4, (C, C), dtype=jnp.float32) * 0.1   # transition.weight
    w_rec = jax.random.normal(k5, (C, VOC), dtype=jnp.float32) * 0.1   # rec_emission.weight
    # NOTE: transition.bias / rec_emission.bias exist in the module but are unused in forward.

    vals, rec = lincrf_forward(words, w_lin, b_lin, w_trans, w_rec)
    jax.block_until_ready((vals, rec))

    vals_ref, rec_ref = reference(words, w_lin, b_lin, w_trans, w_rec)
    np.testing.assert_allclose(np.asarray(vals), np.asarray(vals_ref), atol=1e-5, rtol=1e-5)
    np.testing.assert_allclose(np.asarray(rec), np.asarray(rec_ref), atol=1e-5, rtol=1e-5)
    print("KERNEL_OK")
</pallas_src>

<mosaic_0001>
module attributes {stable_mosaic.version = 11 : i64} {
  func.func @_lincrf_kernel(%arg0: memref<64x1xi32, #tpu.memory_space<vmem>>, %arg1: memref<66x256xf32, #tpu.memory_space<vmem>>, %arg2: memref<16x32xf32, #tpu.memory_space<vmem>>, %arg3: memref<16x256xf32, #tpu.memory_space<vmem>>, %arg4: memref<16x32xf32, #tpu.memory_space<vmem>>) attributes {dimension_semantics = [], scalar_prefetch = 0 : i64, scratch_operands = 0 : i64, tpu.core_type = #tpu.core_type<tc>} {
    %0 = tpu.iota {dimensions = array<i32: 1>} : vector<16x66xi32>
    %c0 = arith.constant 0 : index
    %c0_0 = arith.constant 0 : index
    %1 = vector.load %arg0[%c0, %c0_0] : memref<64x1xi32, #tpu.memory_space<vmem>>, vector<16x1xi32>
    %2 = vector.broadcast %1 : vector<16x1xi32> to vector<16x66xi32>
    %3 = arith.cmpi eq, %0, %2 : vector<16x66xi32>
    %4 = arith.extui %3 : vector<16x66xi1> to vector<16x66xi32>
    %5 = arith.sitofp %4 : vector<16x66xi32> to vector<16x66xf32>
    %c16 = arith.constant 16 : index
    %c0_1 = arith.constant 0 : index
    %6 = vector.load %arg0[%c16, %c0_1] : memref<64x1xi32, #tpu.memory_space<vmem>>, vector<16x1xi32>
    %7 = vector.broadcast %6 : vector<16x1xi32> to vector<16x66xi32>
    %8 = arith.cmpi eq, %0, %7 : vector<16x66xi32>
    %9 = arith.extui %8 : vector<16x66xi1> to vector<16x66xi32>
    %10 = arith.sitofp %9 : vector<16x66xi32> to vector<16x66xf32>
    %11 = arith.addf %5, %10 : vector<16x66xf32>
    %c32 = arith.constant 32 : index
    %c0_2 = arith.constant 0 : index
    %12 = vector.load %arg0[%c32, %c0_2] : memref<64x1xi32, #tpu.memory_space<vmem>>, vector<16x1xi32>
    %13 = vector.broadcast %12 : vector<16x1xi32> to vector<16x66xi32>
    %14 = arith.cmpi eq, %0, %13 : vector<16x66xi32>
    %15 = arith.extui %14 : vector<16x66xi1> to vector<16x66xi32>
    %16 = arith.sitofp %15 : vector<16x66xi32> to vector<16x66xf32>
    %17 = arith.addf %11, %16 : vector<16x66xf32>
    %c48 = arith.constant 48 : index
    %c0_3 = arith.constant 0 : index
    %18 = vector.load %arg0[%c48, %c0_3] : memref<64x1xi32, #tpu.memory_space<vmem>>, vector<16x1xi32>
    %19 = vector.broadcast %18 : vector<16x1xi32> to vector<16x66xi32>
    %20 = arith.cmpi eq, %0, %19 : vector<16x66xi32>
    %21 = arith.extui %20 : vector<16x66xi1> to vector<16x66xi32>
    %22 = arith.sitofp %21 : vector<16x66xi32> to vector<16x66xf32>
    %23 = arith.addf %17, %22 : vector<16x66xf32>
    %c0_4 = arith.constant 0 : index
    %c0_5 = arith.constant 0 : index
    %24 = vector.load %arg1[%c0_4, %c0_5] : memref<66x256xf32, #tpu.memory_space<vmem>>, vector<66x256xf32>
    %cst = arith.constant dense<0.000000e+00> : vector<16x256xf32>
    %25 = tpu.matmul %23, %24, %cst {dimension_numbers = #tpu.dot_dimension_numbers<[1], [0], [0], [1], [0, 0, 1, 1], [], []>, precision = #tpu.contract_precision<fp32>} : vector<16x66xf32>, vector<66x256xf32>, vector<16x256xf32> -> vector<16x256xf32>
    %c0_6 = arith.constant 0 : index
    %c0_7 = arith.constant 0 : index
    %26 = vector.load %arg3[%c0_6, %c0_7] : memref<16x256xf32, #tpu.memory_space<vmem>>, vector<16x256xf32>
    tpu.vector_store %arg3[%c0_6, %c0_7], %25 {strides = array<i32>} : memref<16x256xf32, #tpu.memory_space<vmem>>, vector<16x256xf32>,
    %c0_8 = arith.constant 0 : index
    %c0_9 = arith.constant 0 : index
    %27 = vector.load %arg2[%c0_8, %c0_9] : memref<16x32xf32, #tpu.memory_space<vmem>>, vector<16x32xf32>
    %cst_10 = arith.constant dense<0xFF800000> : vector<16xf32>
    %28 = vector.multi_reduction <maximumf>, %27, %cst_10 [1] : vector<16x32xf32> to vector<16xf32>
    %29 = vector.shape_cast %28 : vector<16xf32> to vector<16x1xf32>
    %30 = vector.broadcast %29 : vector<16x1xf32> to vector<16x32xf32>
    %31 = arith.subf %27, %30 : vector<16x32xf32>
    %32 = math.exp %31 : vector<16x32xf32>
    %cst_11 = arith.constant dense<0.000000e+00> : vector<16xf32>
    %33 = vector.multi_reduction <add>, %32, %cst_11 [1] : vector<16x32xf32> to vector<16xf32>
    %34 = vector.shape_cast %33 : vector<16xf32> to vector<16x1xf32>
    %35 = math.log %34 : vector<16x1xf32>
    %36 = vector.broadcast %35 : vector<16x1xf32> to vector<16x32xf32>
    %37 = arith.subf %31, %36 : vector<16x32xf32>
    %c0_12 = arith.constant 0 : index
    %c0_13 = arith.constant 0 : index
    %38 = vector.load %arg4[%c0_12, %c0_13] : memref<16x32xf32, #tpu.memory_space<vmem>>, vector<16x32xf32>
    tpu.vector_store %arg4[%c0_12, %c0_13], %37 {strides = array<i32>} : memref<16x32xf32, #tpu.memory_space<vmem>>, vector<16x32xf32>,
    return
  }
}

</mosaic_0001>

<bundles_post_ra>
// kernel: tile.18
= control target key start
LH: loop header
LB: loop body
LE: loop exit
PB: predicated region body
PF: predicated region fallthrough
CT: control target
= control target key end

     0   :  { %s28_s0 = inlined_call_operand.vmem [shape: f32[16], index: 0, kind: input, shape index: {}]   ;;  %s29_s1 = inlined_call_operand.vmem [shape: f32[16,16], index: 1, kind: output, shape index: {}]  }
   0x1   :  { %v4_v0 = vld [vmem:[%s28_s0] ss:$0 sm:$0xff] }
   0x2   :  { %5 = vst [vmem:[%s29_s1] sm:$0xff] %v4_v0  ;;  %8 = vst [vmem:[%s29_s1 + $0x8] sm:$0xff] %v4_v0 }

// kernel: lincrf_forward.1
= control target key start
LH: loop header
LB: loop body
LE: loop exit
PB: predicated region body
PF: predicated region fallthrough
CT: control target
= control target key end

     0   :  { %v1051_v2 = vmov 0   ;;  %v1052_v7 = vmov 0.0   ;;  %s1459_s0 = inlined_call_operand.vmem [shape: s32[64,1], index: 0, kind: input, shape index: {}]   ;;  %s1460_s1 = inlined_call_operand.vmem [shape: f32[66,256], index: 1, kind: input, shape index: {}]   ;;  %s1461_s2 = inlined_call_operand.vmem [shape: f32[16,32], index: 2, kind: input, shape index: {}]   ;;  %s1462_s3 = inlined_call_operand.vmem [shape: f32[16,256], index: 3, kind: output, shape index: {0}]   ;;  %s1463_s4 = inlined_call_operand.hbm [shape: f32[16,32], index: 4, kind: output, shape index: {1}]  }
   0x1   :  { %v49_v0 = vld [vmem:[%s1459_s0 + $0x20] sm:$0xff]  ;;  %1018 = vset.pattern.permute.xlu1 %v1051_v2  ;;  %1017 = vset.pattern.permute.xlu0 %v1051_v2  ;;  %v65_v3 = vld [vmem:[%s1459_s0 + $0x30] sm:$0xff]  ;;  %v82_v5 = vld [vmem:[%s1460_s1 + $0x8] sm:$0xff] }
   0x2   :  { %v19_v1 = vld [vmem:[%s1459_s0] sm:$0xff]  ;;  %52 = vperm.xlu1 %1018, %v49_v0   ;;  %v33_v4 = vld [vmem:[%s1459_s0 + $0x10] sm:$0xff]  ;;  %v84_v6 = vld [vmem:[%s1460_s1 + $0x18] sm:$0xff]  ;;  %586 = vmatprep.mubr.f32.mxu0 %v1052_v7  ;;  %v113_v8 = vand.u32 4294901760, %v82_v5 }
   0x3   :  { %22 = vperm.xlu0 %1017, %v19_v1   ;;  %195 = vmatprep.mubr.f32.mxu1 %v1052_v7  ;;  %v117_v9 = vand.u32 4294901760, %v84_v6  ;;  %v81_v10 = vld [vmem:[%s1460_s1] sm:$0xff]  ;;  %v83_v11 = vld [vmem:[%s1460_s1 + $0x10] sm:$0xff]  ;;  %v86_v12 = vld [vmem:[%s1460_s1 + $0x28] sm:$0xff] }
   0x4   :  { %v34_v13 = vld [vmem:[%s1459_s0 + $0x18] sm:$0xff]  ;;  %v115_v14 = vand.u32 4294901760, %v81_v10  ;;  %v119_v15 = vand.u32 4294901760, %v83_v11  ;;  %v121_v17 = vand.u32 4294901760, %v86_v12  ;;  %v85_v18 = vld [vmem:[%s1460_s1 + $0x20] sm:$0xff]  ;;  %v87_v19 = vld [vmem:[%s1460_s1 + $0x30] sm:$0xff] }
   0x5   :  { %v88_v16 = vld [vmem:[%s1460_s1 + $0x38] sm:$0xff]  ;;  %v1122_v20 = vpack.c.bf16 %v117_v9, %v113_v8  ;;  %v90_v22 = vld [vmem:[%s1460_s1 + $0x48] sm:$0xff]  ;;  %v89_v24 = vld [vmem:[%s1460_s1 + $0x40] sm:$0xff]  ;;  %v123_v29 = vand.u32 4294901760, %v85_v18 }
   0x6   :  { %68 = vperm.xlu1 %1018, %v65_v3   ;;  %v125_v21 = vand.u32 4294901760, %v88_v16  ;;  %v92_v23 = vld [vmem:[%s1460_s1 + $0x58] sm:$0xff]  ;;  %v20_v25 = vld [vmem:[%s1459_s0 + $0x8] sm:$0xff]  ;;  %v1136_v26 = vpack.c.bf16 %v119_v15, %v115_v14  ;;  %v1138_v27 = vsub.f32 %v81_v10, %v115_v14  ;;  %v1140_v28 = vsub.f32 %v83_v11, %v119_v15  ;;  %v91_v30 = vld [vmem:[%s1460_s1 + $0x50] sm:$0xff] }
   0x7   :  { %36 = vperm.xlu0 %1017, %v33_v4  }
   0x8   :  { %10 = vsyncpa [#allocation3], 0  ;;  %945 = vmatprep.subr.bf16.mxu0 %v1122_v20  ;;  %897 = vmatprep.subr.bf16.mxu1 %v1122_v20  ;;  %v1147_v31 = vpack.c.bf16 %v125_v21, %v121_v17  ;;  %v127_v32 = vand.u32 4294901760, %v87_v19  ;;  %v129_v33 = vand.u32 4294901760, %v90_v22  ;;  %v133_v34 = vand.u32 4294901760, %v92_v23  ;;  %v1154_v37 = vld [vmem:[%s1460_s1 + $0x68] sm:$0xff] }
   0x9   :  { %947 = vmatpush1.bf16.msra.mxu0 %v1136_v26  ;;  %899 = vmatpush1.bf16.msra.mxu1 %v1136_v26  ;;  %v131_v35 = vand.u32 4294901760, %v89_v24  ;;  %v135_v36 = vand.u32 4294901760, %v91_v30  ;;  %v1159_v38 = vld [vmem:[%s1460_s1 + $0x78] sm:$0xff]  ;;  %v1161_v39 = vsub.f32 %v82_v5, %v113_v8  ;;  %v137_v41 = vand.u32 4294901760, %v1154_v37  ;;  %v93_v43 = vld [vmem:[%s1460_s1 + $0x60] sm:$0xff]  ;;  %v95_v44 = vld [vmem:[%s1460_s1 + $0x70] sm:$0xff] }
   0xa   :  { %39 = vperm.xlu1 %1018, %v34_v13   ;;  %v1163_v40 = vpack.c.bf16 %v127_v32, %v123_v29  ;;  %v141_v42 = vand.u32 4294901760, %v1159_v38  ;;  %v66_v45 = vld [vmem:[%s1459_s0 + $0x38] sm:$0xff]  ;;  %v50_v46 = vld [vmem:[%s1459_s0 + $0x28] sm:$0xff]  ;;  %v1179_v47 = vsub.f32 %v84_v6, %v117_v9  ;;  %949 = vmatprep.subr.bf16.mxu0 %v1147_v31  ;;  %v1183_v48 = vpack.c.bf16 %v133_v34, %v129_v33  ;;  %v97_v63 = vld [vmem:[%s1460_s1 + $0x80] sm:$0x3] }
   0xb   :  { %25 = vperm.xlu0 %1017, %v20_v25   ;;  %901 = vmatprep.subr.bf16.mxu1 %v1147_v31  ;;  %v1185_v49 = vpack.c.bf16 %v135_v36, %v131_v35  ;;  %v139_v50 = vand.u32 4294901760, %v93_v43  ;;  %v1187_v51 = vsub.f32 %v86_v12, %v121_v17  ;;  %v1189_v52 = vsub.f32 %v88_v16, %v125_v21  ;;  %v98_v61 = vld [vmem:[%s1460_s1 + $0x88] sm:$0x3] }
   0xc   :  { %v1191_v53 = vsub.f32 %v85_v18, %v123_v29  ;;  %v1193_v54 = vsub.f32 %v87_v19, %v127_v32  ;;  %v1196_v55 = vsub.f32 %v90_v22, %v129_v33  ;;  %v1198_v56 = vsub.f32 %v92_v23, %v133_v34 }
   0xd   :  { %951 = vmatpush1.bf16.msra.mxu0 %v1163_v40  ;;  %903 = vmatpush1.bf16.msra.mxu1 %v1163_v40  ;;  %v1201_v57 = vsub.f32 %v89_v24, %v131_v35  ;;  %v143_v58 = vand.u32 4294901760, %v95_v44  ;;  %v1203_v59 = vsub.f32 %v91_v30, %v135_v36  ;;  %v1205_v60 = vpack.c.bf16 %v141_v42, %v137_v41 }
   0xe   :  { %71 = vperm.xlu1 %1018, %v66_v45   ;;  %vm106_vm0 = vcmask 1041408   ;;  %953 = vmatprep.subr.bf16.mxu0 %v1183_v48  ;;  %v220_v0 = vand.u32 4294901760, %v1161_v39  ;;  %v232_v1 = vand.u32 4294901760, %v1179_v47  ;;  %v226_v4 = vand.u32 4294901760, %v1138_v27 }
   0xf   :  { %55 = vperm.xlu0 %1017, %v50_v46   ;;  %905 = vmatprep.subr.bf16.mxu1 %v1183_v48  ;;  %v1212_v62 = vsel %vm106_vm0, %v98_v61, 0  ;;  %v1221_v2 = vpack.c.bf16 %v143_v58, %v139_v50  ;;  %v1223_v3 = vsel %vm106_vm0, %v97_v63, 0  ;;  %v238_v5 = vand.u32 4294901760, %v1140_v28 }
  0x10   :  { %v1230_v6 = vand.u32 4294901760, %v1212_v62  ;;  %v221_v9 = vsub.f32 %v1161_v39, %v220_v0  ;;  %v233_v10 = vsub.f32 %v1179_v47, %v232_v1  ;;  %v1237_v11 = vand.u32 4294901760, %v1223_v3 }
  0x11   :  { %955 = vmatpush1.bf16.msra.mxu0 %v1185_v49  ;;  %907 = vmatpush1.bf16.msra.mxu1 %v1185_v49  ;;  %v1232_v8 = vpack.c.bf16 %v238_v5, %v226_v4  ;;  %v960_v12 = vpack.c.bf16 %v232_v1, %v220_v0  ;;  %v227_v13 = vsub.f32 %v1138_v27, %v226_v4  ;;  %v244_v17 = vand.u32 4294901760, %v1187_v51 }
  0x12   :  { %957 = vmatprep.subr.bf16.mxu0 %v1205_v60  ;;  %909 = vmatprep.subr.bf16.mxu1 %v1205_v60  ;;  %v239_v14 = vsub.f32 %v1140_v28, %v238_v5  ;;  %v222_v15 = vand.u32 4294901760, %v221_v9  ;;  %v234_v16 = vand.u32 4294901760, %v233_v10  ;;  %v256_v18 = vand.u32 4294901760, %v1189_v52 }
  0x13   :  { %v228_v19 = vand.u32 4294901760, %v227_v13  ;;  %v250_v22 = vand.u32 4294901760, %v1191_v53  ;;  %v262_v23 = vand.u32 4294901760, %v1193_v54  ;;  %v1250_v24 = vsub.f32 %v1154_v37, %v137_v41 }
  0x14   :  { %v240_v21 = vand.u32 4294901760, %v239_v14  ;;  %v1253_v25 = vsub.f32 %v1159_v38, %v141_v42  ;;  %v1255_v29 = vsub.f32 %v93_v43, %v139_v50  ;;  %v1257_v30 = vsub.f32 %v95_v44, %v143_v58 }
  0x15   :  { %959 = vmatpush1.bf16.msra.mxu0 %v1221_v2  ;;  %911 = vmatpush1.bf16.msra.mxu1 %v1221_v2  ;;  %v912_v32 = vpack.c.bf16 %v234_v16, %v222_v15  ;;  %v1259_v33 = vpack.c.bf16 %v256_v18, %v244_v17  ;;  %v1265_v35 = vpack.c.bf16 %v262_v23, %v250_v22  ;;  %v268_v38 = vand.u32 4294901760, %v1196_v55 }
  0x16   :  { %537 = vmatprep.subr.mxu0 %v1230_v6  ;;  %146 = vmatprep.subr.mxu1 %v1230_v6  ;;  %v1261_v34 = vpack.c.bf16 %v240_v21, %v228_v19  ;;  %v245_v36 = vsub.f32 %v1187_v51, %v244_v17  ;;  %v257_v37 = vsub.f32 %v1189_v52, %v256_v18  ;;  %v280_v41 = vand.u32 4294901760, %v1198_v56 }
  0x17   :  { %v251_v42 = vsub.f32 %v1191_v53, %v250_v22  ;;  %v263_v43 = vsub.f32 %v1193_v54, %v262_v23  ;;  %v274_v44 = vand.u32 4294901760, %v1201_v57  ;;  %v286_v50 = vand.u32 4294901760, %v1203_v59 }
  0x18   :  { %v246_v45 = vand.u32 4294901760, %v245_v36  ;;  %v258_v46 = vand.u32 4294901760, %v257_v37  ;;  %v269_v58 = vsub.f32 %v1196_v55, %v268_v38  ;;  %v1276_v61 = vpack.c.bf16 %v280_v41, %v268_v38 }
  0x19   :  { %539 = vmatpush1.msra.mxu0 %v1237_v11  ;;  %148 = vmatpush1.msra.mxu1 %v1237_v11  ;;  %v252_v63 = vand.u32 4294901760, %v251_v42  ;;  %v264_v0 = vand.u32 4294901760, %v263_v43  ;;  %v281_v1 = vsub.f32 %v1198_v56, %v280_v41  ;;  %v1281_v5 = vpack.c.bf16 %v286_v50, %v274_v44 }
  0x1a   :  { %961 = vmatprep.subr.bf16.mxu0 %v960_v12  ;;  %913 = vmatprep.subr.bf16.mxu1 %v912_v32  ;;  %v1279_v4 = vpack.c.bf16 %v258_v46, %v246_v45  ;;  %v270_v9 = vand.u32 4294901760, %v269_v58  ;;  %v292_v10 = vand.u32 4294901760, %v1250_v24  ;;  %v304_v14 = vand.u32 4294901760, %v1253_v25 }
  0x1b   :  { %v1284_v12 = vpack.c.bf16 %v264_v0, %v252_v63  ;;  %v282_v13 = vand.u32 4294901760, %v281_v1  ;;  %v275_v15 = vsub.f32 %v1201_v57, %v274_v44  ;;  %v287_v16 = vsub.f32 %v1203_v59, %v286_v50  ;;  %v1310_v63 = vld [vmem:[%s1461_s2] sm:$0xff] }
  0x1c   :  { %v298_v17 = vand.u32 4294901760, %v1255_v29  ;;  %v310_v18 = vand.u32 4294901760, %v1257_v30  ;;  %v293_v19 = vsub.f32 %v1250_v24, %v292_v10  ;;  %v1294_v22 = vpack.c.bf16 %v304_v14, %v292_v10  ;;  %v1321_v10 = vld [vmem:[%s1461_s2 + $0x8] sm:$0xff]  ;;  %s1053_s2 = smov [#allocation2]  }
  0x1d   :  { %v1292_v21 = vpack.c.bf16 %v282_v13, %v270_v9  ;;  %v276_v23 = vand.u32 4294901760, %v275_v15  ;;  %v305_v32 = vsub.f32 %v1253_v25, %v304_v14  ;;  %v288_v36 = vand.u32 4294901760, %v287_v16  ;;  %s875_s17 = sshll.u32 %s1053_s2, 4  ;;  %s876_s17 = int_to_ptr.vmem [resolvable:$true] %s875_s17 }
  0x1e   :  { %v1297_v37 = vpack.c.bf16 %v310_v18, %v298_v17  ;;  %v294_v38 = vand.u32 4294901760, %v293_v19  ;;  %v299_v42 = vsub.f32 %v1255_v29, %v298_v17  ;;  %v311_v43 = vsub.f32 %v1257_v30, %v310_v18  ;;  %s1027_s18 = scalar_lea.vmem %s876_s17, 256  ;;  %p1032_p1 = scmp.lt.s32.totalorder %s876_s17, %s876_s17 }
  0x1f   :  { %v306_v41 = vand.u32 4294901760, %v305_v32  ;;  %v1301_v44 = vpack.c.bf16 %v288_v36, %v276_v23  ;;  %vm841_vm1 = vcmask 261120   ;;  %v928_v0 = vpack.c.bf16 %v1179_v47, %v1161_v39  ;;  %p1028_p0 = scmp.ne.s32.totalorder %s876_s17, %s1027_s18  ;;  %p1033_p2 = scmp.lt.s32.totalorder %s1027_s18, %s1027_s18 }
  0x20   :  { %v300_v46 = vand.u32 4294901760, %v299_v42  ;;  %v312_v50 = vand.u32 4294901760, %v311_v43  ;;  %v842_v1 = vsel %vm841_vm1, %v1310_v63, -inf  ;;  %v930_v9 = vpack.c.bf16 %v1140_v28, %v1138_v27 }
  0x21   :  { %v1303_v45 = vpack.c.bf16 %v306_v41, %v294_v38  ;;  %v845_v14 = vsel %vm841_vm1, %v1321_v10, -inf  ;;  %v17_v23 = vlaneseq  ;;  %vm99_vm8 = vcmask 539648   ;;  %p1034_p3 = por %p1033_p2, %p1032_p1 }
  0x22   :  { %v1305_v58 = vpack.c.bf16 %v312_v50, %v300_v46  ;;  %v1466_v27 = vpack.c.bf16 %v1198_v56, %v1196_v55  ;;  %v1467_v28 = vpack.c.bf16 %v1203_v59, %v1201_v57  ;;  %v1469_v39 = vpack.c.bf16 %v1257_v30, %v1255_v29 }
  0x23   :  { %v18_v32 = vand.u32 127, %v17_v23  ;;  %p1035_p4 = pnand %p1034_p3, %p1028_p0 }
  0x2e   :  { %843 = vmax.xlane.f32.xlu0 %v842_v1 }
  0x32   :  { %846 = vmax.xlane.f32.xlu1 %v845_v14 }
  0x81   :  { %v53_v36 = vpop.permute.xlu1 %52 }
  0x82   :  { %v23_v38 = vpop.permute.xlu0 %22  ;;  %vm57_vm3 = vcmp.eq.s32.totalorder %v18_v32, %v53_v36 }
  0x83   :  { %vm27_vm2 = vcmp.eq.s32.totalorder %v18_v32, %v23_v38  ;;  %v892_v1 = vsel %vm57_vm3, 1.0, %v1052_v7 }
  0x84   :  { %v888_v43 = vsel %vm27_vm2, 1.0, %v1052_v7 }
  0x85   :  { %v69_v41 = vpop.permute.xlu1 %68 }
  0x86   :  { %v37_v42 = vpop.permute.xlu0 %36  ;;  %vm73_vm5 = vcmp.eq.s32.totalorder %v18_v32, %v69_v41 }
  0x87   :  { %vm41_vm4 = vcmp.eq.s32.totalorder %v18_v32, %v37_v42  ;;  %v894_v23 = vsel %vm73_vm5, 1.0, %v1052_v7 }
  0x88   :  { %v890_v46 = vsel %vm41_vm4, 1.0, %v1052_v7 }
  0x89   :  { %v47_v50 = vadd.f32 %v890_v46, %v888_v43  ;;  %v40_v14 = vpop.permute.xlu1 %39 }
  0x8a   :  { %v26_v18 = vpop.permute.xlu0 %25  ;;  %vm42_vm6 = vcmp.eq.s32.totalorder %v18_v32, %v40_v14 }
  0x8b   :  { %v63_v19 = vadd.f32 %v892_v1, %v47_v50  ;;  %vm28_vm7 = vcmp.eq.s32.totalorder %v18_v32, %v26_v18  ;;  %v891_v38 = vsel %vm42_vm6, 1.0, %v1052_v7 }
  0x8c   :  { %v889_v36 = vsel %vm28_vm7, 1.0, %v1052_v7 }
  0x8d   :  { %v79_v42 = vadd.f32 %v894_v23, %v63_v19  ;;  %v72_v17 = vpop.permute.xlu1 %71  ;;  %v48_v15 = vadd.f32 %v891_v38, %v889_v36  ;;  %v321_v36 = vsub.f32 %v1223_v3, %v1237_v11 }
  0x8e   :  { %v56_v16 = vpop.permute.xlu0 %55  ;;  %vm74_vm9 = vcmp.eq.s32.totalorder %v18_v32, %v72_v17 }
  0x8f   :  { %vm58_vm10 = vcmp.eq.s32.totalorder %v18_v32, %v56_v16  ;;  %v101_v41 = vsel %vm99_vm8, %v79_v42, 0  ;;  %v895_v18 = vsel %vm74_vm9, 1.0, %v1052_v7  ;;  %v315_v32 = vsub.f32 %v1212_v62, %v1230_v6 }
  0x90   :  { %v893_v43 = vsel %vm58_vm10, 1.0, %v1052_v7  ;;  %v1344_v46 = vand.u32 4294901760, %v101_v41  ;;  %v322_v3 = vand.u32 4294901760, %v321_v36 }
  0x91   :  { %v64_v50 = vadd.f32 %v893_v43, %v48_v15  ;;  %v316_v62 = vand.u32 4294901760, %v315_v32 }
  0x92   :  { %v1348_v1 = vsub.f32 %v101_v41, %v1344_v46 }
  0x93   :  { %v80_v14 = vadd.f32 %v895_v18, %v64_v50 }
  0x94   :  { %v198_v13 = vand.u32 4294901760, %v1348_v1 }
  0x95   :  { %v104_v19 = vsel %vm99_vm8, %v80_v14, 0 }
  0x96   :  { %v1351_v23 = vand.u32 4294901760, %v104_v19  ;;  %590 = vmatmul.mubr.f32.vlgmr.msra.gmra.mrb[0].mxu0 %v198_v13  ;;  %v199_v16 = vsub.f32 %v1348_v1, %v198_v13 }
  0x97   :  { %963 = vmatpush1.bf16.msra.mxu0 %v1232_v8  ;;  %595 = vmatprep.mubr.f32.mxu0 %v1052_v7 }
  0x98   :  { %v1357_v15 = vsub.f32 %v104_v19, %v1351_v23  ;;  %965 = vmatprep.subr.bf16.mxu0 %v1259_v33  ;;  %v200_v17 = vand.u32 4294901760, %v199_v16 }
  0x9a   :  { %201 = vmatmul.mubr.f32.vlgmr.msra.gmra.mrb[0].mxu1 %v200_v17  ;;  %v209_v38 = vand.u32 4294901760, %v1357_v15 }
  0x9b   :  { %915 = vmatpush1.bf16.msra.mxu1 %v1261_v34  ;;  %967 = vmatpush1.bf16.msra.mxu0 %v1265_v35  ;;  %v317_v34 = vsub.f32 %v315_v32, %v316_v62  ;;  %v323_v35 = vsub.f32 %v321_v36, %v322_v3 }
  0x9c   :  { %599 = vmatmul.mubr.f32.gmra.mrb[2].mxu0 %v209_v38  ;;  %917 = vmatprep.subr.bf16.mxu1 %v1279_v4  ;;  %v210_v8 = vsub.f32 %v1357_v15, %v209_v38 }
  0x9d   :  { %969 = vmatprep.subr.bf16.mxu0 %v1276_v61  ;;  %206 = vmatprep.mubr.f32.mxu1 %v1052_v7  ;;  %v318_v61 = vand.u32 4294901760, %v317_v34  ;;  %v324_v4 = vand.u32 4294901760, %v323_v35 }
  0x9e   :  { %v211_v33 = vand.u32 4294901760, %v210_v8  ;;  %723 = vmatprep.mubr.f32.mxu0 %v1052_v7 }
  0x9f   :  { %919 = vmatpush1.bf16.msra.mxu1 %v1284_v12  ;;  %971 = vmatpush1.bf16.msra.mxu0 %v1281_v5 }
  0xa0   :  { %212 = vmatmul.mubr.f32.gmra.mrb[2].mxu1 %v211_v33  ;;  %921 = vmatprep.subr.bf16.mxu1 %v1292_v21 }
  0xa1   :  { %973 = vmatprep.subr.bf16.mxu0 %v1294_v22  ;;  %372 = vmatprep.mubr.f32.mxu1 %v1052_v7 }
  0xa3   :  { %923 = vmatpush1.bf16.msra.mxu1 %v1301_v44  ;;  %975 = vmatpush1.bf16.msra.mxu0 %v1297_v37 }
  0xa4   :  { %925 = vmatprep.subr.bf16.mxu1 %v1303_v45  ;;  %672 = vmatprep.subr.mxu0 %v316_v62 }
  0xa7   :  { %927 = vmatpush1.bf16.msra.mxu1 %v1305_v58  ;;  %676 = vmatpush1.msra.mxu0 %v322_v3 }
  0xa8   :  { %725 = vmatmul.mubr.f32.vlgmr.msra.gmra.mrb[0].mxu0 %v1344_v46  ;;  %977 = vmatprep.subr.bf16.mxu0 %v1122_v20  ;;  %v1464_v20 = vpack.c.bf16 %v1189_v52, %v1187_v51 }
  0xa9   :  { %979 = vmatpush1.bf16.msra.mxu0 %v1136_v26  ;;  %319 = vmatprep.subr.mxu1 %v318_v61  ;;  %v1465_v26 = vpack.c.bf16 %v1193_v54, %v1191_v53 }
  0xaa   :  { %730 = vmatprep.mubr.f32.mxu0 %v1052_v7  ;;  %981 = vmatprep.subr.bf16.mxu0 %v1147_v31  ;;  %v1468_v31 = vpack.c.bf16 %v1253_v25, %v1250_v24 }
  0xab   :  { %325 = vmatpush1.msra.mxu1 %v324_v4 }
  0xac   :  { %374 = vmatmul.mubr.f32.vlgmr.msra.gmra.mrb[0].mxu1 %v1344_v46  ;;  %929 = vmatprep.subr.bf16.mxu1 %v928_v0 }
  0xad   :  { %732 = vmatmul.mubr.f32.gmra.mrb[2].mxu0 %v1351_v23  ;;  %931 = vmatpush1.bf16.msra.mxu1 %v930_v9 }
  0xae   :  { %983 = vmatpush1.bf16.msra.mxu0 %v1163_v40  ;;  %379 = vmatprep.mubr.f32.mxu1 %v1052_v7 }
  0xaf   :  { %933 = vmatprep.subr.bf16.mxu1 %v1464_v20  ;;  %985 = vmatprep.subr.bf16.mxu0 %v1183_v48 }
  0xb0   :  { %381 = vmatmul.mubr.f32.gmra.mrb[2].mxu1 %v1351_v23  ;;  %820 = vmatprep.mubr.f32.mxu0 %v1052_v7 }
  0xb1   :  { %935 = vmatpush1.bf16.msra.mxu1 %v1465_v26  ;;  %487 = vmatprep.mubr.f32.mxu1 %v1052_v7 }
  0xb2   :  { %987 = vmatpush1.bf16.msra.mxu0 %v1185_v49  ;;  %937 = vmatprep.subr.bf16.mxu1 %v1466_v27 }
  0xb3   :  { %989 = vmatprep.subr.bf16.mxu0 %v1205_v60 }
  0xb5   :  { %939 = vmatpush1.bf16.msra.mxu1 %v1467_v28 }
  0xb6   :  { %991 = vmatpush1.bf16.msra.mxu0 %v1221_v2  ;;  %941 = vmatprep.subr.bf16.mxu1 %v1468_v31 }
  0xb7   :  { %771 = vmatprep.subr.mxu0 %v1230_v6 }
  0xb9   :  { %943 = vmatpush1.bf16.msra.mxu1 %v1469_v39 }
  0xba   :  { %773 = vmatpush1.msra.mxu0 %v1237_v11  ;;  %437 = vmatprep.subr.mxu1 %v315_v32 }
  0xbb   :  { %822 = vmatmul.mubr.f32.vlgmr.msra.gmra.mrb[0].mxu0 %v1344_v46  ;;  %v844_v40 = vpop.xlane.xlu0 %843 }
  0xbc   :  { %v848_v47 = vsub.f32 %v1310_v63, %v844_v40  ;;  %827 = vmatprep.mubr.f32.mxu0 %v1052_v7 }
  0xbd   :  { %440 = vmatpush1.msra.mxu1 %v321_v36 }
  0xbe   :  { %v850_v48 = vmul.f32 1.442695, %v848_v47  ;;  %490 = vmatmul.mubr.f32.vlgmr.msra.gmra.mrb[0].mxu1 %v1348_v1 }
  0xbf   :  { %829 = vmatmul.mubr.f32.gmra.mrb[2].mxu0 %v1351_v23  ;;  %495 = vmatprep.mubr.f32.mxu1 %v1052_v7  ;;  %v847_v49 = vpop.xlane.xlu1 %846 }
  0xc0   :  { %1019 = vpow2.f32 %v850_v48  ;;  %v849_v51 = vsub.f32 %v1321_v10, %v847_v49 }
  0xc2   :  { %498 = vmatmul.mubr.f32.gmra.mrb[2].mxu1 %v1357_v15  ;;  %v852_v52 = vmul.f32 1.442695, %v849_v51 }
  0xc4   :  { %1021 = vpow2.f32 %v852_v52 }
  0xca   :  { %v1020_v53 = vpop.eup %1019 }
  0xcb   :  { %v854_v54 = vsel %vm841_vm1, %v1020_v53, 0.0 }
  0xcc   :  { %855 = vadd.xlane.f32.xlu0 %v854_v54 }
  0xce   :  { %v1022_v55 = vpop.eup %1021 }
  0xcf   :  { %v857_v56 = vsel %vm841_vm1, %v1022_v55, 0.0 }
  0xd0   :  { %858 = vadd.xlane.f32.xlu0 %v857_v56 }
 0x159   :  { %v856_v57 = vpop.xlane.xlu0 %855 }
 0x15a   :  { %1023 = vlog2.f32 %v856_v57 }
 0x15d   :  { %v859_v59 = vpop.xlane.xlu0 %858 }
 0x15e   :  { %1025 = vlog2.f32 %v859_v59 }
 0x164   :  { %v1024_v7 = vpop.eup %1023 }
 0x165   :  { %v861_v60 = vmul.f32 0.6931472, %v1024_v7 }
 0x167   :  { %v864_v2 = vsub.f32 %v848_v47, %v861_v60 }
 0x168   :  { %v1026_v6 = vpop.eup %1025 }
 0x169   :  { %866 = vst.msk [vmem:[#allocation2] sm:$0xff] %vm841_vm1, %v864_v2  ;;  %v863_v11 = vmul.f32 0.6931472, %v1026_v6 }
 0x16b   :  { %v865_v24 = vsub.f32 %v849_v51, %v863_v11 }
 0x16d   :  { %867 = vst.msk [vmem:[#allocation2 + $0x8] sm:$0xff] %vm841_vm1, %v865_v24 }
 0x16e   :  { %1038 = shalt.err (!%p1035_p4)
}
 0x16f   :  { %s1039_s21 = scalar_lea.hbm %s1463_s4, 256 }
 0x170   :  { %p1040_p5 = scmp.ne.s32.totalorder %s1463_s4, %s1039_s21  ;;  %p1043_p6 = scmp.lt.u32.totalorder %s1039_s21, %s1463_s4 }
 0x172   :  { %p1045_p7 = pnand %p1043_p6, %p1040_p5 }
 0x174   :  { %1048 = shalt.err (!%p1045_p7)
}
 0x175   :  { %s1054_s26 = smov 128   ;;  %s1055_s27 = smov 8  }
 0x176   :  { %881 = dma.vmem_to_hbm [thread:$0]  %s876_s17, 256, %s1463_s4, [#allocation3], %s1054_s26, %s1054_s26, %s1055_s27  }
 0x18e   :  { %v823_v25 = vpop.f32.mrb[0].mxu0 }
 0x18f   :  { %v825_v29 = vpop.f32.mrb[1].mxu0 }
 0x191   :  { %v491_v30 = vpop.f32.mrb[0].mxu1 }
 0x192   :  { %v992_v5 = vadd.f32 %v823_v25, %v491_v30  ;;  %v830_v12 = vpop.f32.mrb[2].mxu0  ;;  %v493_v21 = vpop.f32.mrb[1].mxu1 }
 0x193   :  { %v993_v22 = vadd.f32 %v825_v29, %v493_v21  ;;  %v832_v37 = vpop.f32.mrb[3].mxu0 }
 0x194   :  { %835 = vst [vmem:[%s1462_s3] sm:$0xff] %v992_v5 }
 0x195   :  { %836 = vst [vmem:[%s1462_s3 + $0x8] sm:$0xff] %v993_v22  ;;  %v499_v44 = vpop.f32.mrb[2].mxu1 }
 0x196   :  { %v994_v45 = vadd.f32 %v830_v12, %v499_v44  ;;  %v501_v58 = vpop.f32.mrb[3].mxu1 }
 0x197   :  { %v995_v63 = vadd.f32 %v832_v37, %v501_v58 }
 0x198   :  { %837 = vst [vmem:[%s1462_s3 + $0x10] sm:$0xff] %v994_v45 }
 0x199   :  { %838 = vst [vmem:[%s1462_s3 + $0x18] sm:$0xff] %v995_v63 }
 0x19a   :  { %1049 = dma.done.wait [#allocation3], 256  }
 0x19b   :  { %1050 = vsyncadd [#allocation3], 4294967040 }
 0x19c   :  { %887 = vsyncpa [#allocation3], 1 }

</bundles_post_ra>
